<compile_context>
chip_gen: v5e
topology: v5e:2x2
jax: 0.10.0
libtpu: 0.0.40
codegen_flags: <defaults>
</compile_context>

<pallas_src>
import functools

import jax
import jax.numpy as jnp
from jax.experimental import pallas as pl
from jax.experimental.pallas import tpu as pltpu

_LANES = 128


def _round_up(a: int, b: int) -> int:
    return ((a + b - 1) // b) * b


def _poly_linear_kernel(w_ref, b_ref, x_ref, out_ref, *, degree: int):
    # w_ref  : (degree,)          f32 SMEM (scalar prefetch; nn.Linear weight, flattened)
    # b_ref  : (1,)               f32 SMEM (scalar prefetch)
    # x_ref  : (block_rows, 128)  f32 VMEM
    # out_ref: (block_rows, 128)  f32 VMEM
    #
    # torch.stack order is [x**degree, ..., x**1], so weight element j
    # multiplies x**(degree - j).  Horner form:
    #   p(x) = (((w0*x + w1)*x + w2)*x + ... + w_{deg-1})*x + bias
    xv = x_ref[...]                                    # (block_rows, 128)
    if degree == 1:
        out_ref[...] = xv * w_ref[0] + b_ref[0]
    else:
        # Fold the accumulator init into the first Horner step.
        acc = xv * w_ref[0] + w_ref[1]
        for j in range(2, degree):
            acc = acc * xv + w_ref[j]
        out_ref[...] = acc * xv + b_ref[0]


def polynomial_regression(x, weight, bias, *, block_rows: int = 2048):
    """x: (N,) f32; weight: (1, degree) f32; bias: (1,) f32 -> (N, 1) f32."""
    n = x.shape[0]
    degree = weight.shape[1]
    if degree < 1:
        raise ValueError("degree must be >= 1 (got weight shape %s)" % (weight.shape,))

    x = x.astype(jnp.float32)
    w_flat = weight.astype(jnp.float32).reshape(degree)
    bias = bias.astype(jnp.float32).reshape(1)

    # Lane-dense slab: view x as (padded_rows, 128).  Block dims must be
    # multiples of (8, 128).
    rows = pl.cdiv(n, _LANES)
    rows8 = _round_up(rows, 8)
    blk = max(8, min(_round_up(block_rows, 8), rows8))
    # Keep the grid >= 2 steps whenever the data is large enough: lets
    # dimension_semantics=("parallel",) shard across v7x's 2 TensorCores.
    if rows8 >= 16:
        blk = min(blk, max(8, _round_up(rows8 // 2, 8)))
    padded_rows = _round_up(rows, blk)
    n_pad = padded_rows * _LANES

    if n_pad == n:
        # Aligned fast path: reshape is a free view, no pad copy.
        x2 = x.reshape(padded_rows, _LANES)
    else:
        x2 = jnp.pad(x, (0, n_pad - n)).reshape(padded_rows, _LANES)

    # Double-buffered in + out footprint, with headroom (keeps large
    # caller-chosen blocks compiling under v5e's 16 MiB scoped default).
    vmem_need = 2 * 2 * blk * _LANES * 4
    vmem_limit = int(min(max(2 * vmem_need, 16 << 20), 64 << 20))

    kernel = functools.partial(_poly_linear_kernel, degree=degree)
    grid_spec = pltpu.PrefetchScalarGridSpec(
        num_scalar_prefetch=2,                       # weight, bias -> SMEM once
        grid=(padded_rows // blk,),
        in_specs=[
            pl.BlockSpec((blk, _LANES), lambda i, w, b: (i, 0)),
        ],
        out_specs=pl.BlockSpec((blk, _LANES), lambda i, w, b: (i, 0)),
    )
    out_slab = pl.pallas_call(
        kernel,
        out_shape=jax.ShapeDtypeStruct((padded_rows, _LANES), jnp.float32),
        grid_spec=grid_spec,
        compiler_params=pltpu.CompilerParams(
            dimension_semantics=("parallel",),
            vmem_limit_bytes=vmem_limit,
        ),
    )(w_flat, bias, x2)

    out_flat = out_slab.reshape(-1)
    if n_pad != n:
        out_flat = out_flat[:n]
    return out_flat.reshape(n, 1)


def _reference(x, weight, bias):
    degree = weight.shape[1]
    feats = jnp.stack([x ** i for i in range(degree, 0, -1)], axis=1)  # (N, deg)
    return feats @ weight.T + bias                                     # (N, 1)


if __name__ == "__main__":
    DEGREE = 4

    key = jax.random.PRNGKey(0)
    kx, kw, kb, kx2, kx3 = jax.random.split(key, 5)

    # Deterministic param init (uniform in +/- 1/sqrt(fan_in), like nn.Linear).
    bound = 1.0 / (DEGREE ** 0.5)
    weight = jax.random.uniform(kw, (1, DEGREE), jnp.float32, -bound, bound)
    bias = jax.random.uniform(kb, (1,), jnp.float32, -bound, bound)

    # Test 1: tiny N (matches the module's typical toy usage); single block.
    N1 = 16
    x1 = jax.random.uniform(kx, (N1,), jnp.float32, -1.0, 1.0)
    out1 = jax.block_until_ready(polynomial_regression(x1, weight, bias))
    ref1 = _reference(x1, weight, bias)
    assert out1.shape == (N1, 1), out1.shape
    assert jnp.allclose(out1, ref1, atol=1e-5, rtol=1e-5), (out1, ref1)

    # Test 2: ragged N with multiple grid steps (exercises padding + tiling).
    N2 = 2000
    x2 = jax.random.uniform(kx2, (N2,), jnp.float32, -1.0, 1.0)
    out2 = jax.block_until_ready(
        polynomial_regression(x2, weight, bias, block_rows=8))
    ref2 = _reference(x2, weight, bias)
    assert out2.shape == (N2, 1), out2.shape
    assert jnp.allclose(out2, ref2, atol=1e-5, rtol=1e-5)

    # Test 3: slab-aligned N (exercises the no-pad / no-slice fast path and
    # the >=2-block grid split with the default block size).
    N3 = 2048
    x3 = jax.random.uniform(kx3, (N3,), jnp.float32, -1.0, 1.0)
    out3 = jax.block_until_ready(polynomial_regression(x3, weight, bias))
    ref3 = _reference(x3, weight, bias)
    assert out3.shape == (N3, 1), out3.shape
    assert jnp.allclose(out3, ref3, atol=1e-5, rtol=1e-5)

    print("KERNEL_OK")
</pallas_src>

<mosaic_0001>
module attributes {stable_mosaic.version = 11 : i64} {
  func.func @_poly_linear_kernel(%arg0: i32, %arg1: memref<4xf32, #tpu.memory_space<smem>>, %arg2: memref<1xf32, #tpu.memory_space<smem>>, %arg3: memref<8x128xf32, #tpu.memory_space<vmem>>, %arg4: memref<8x128xf32, #tpu.memory_space<vmem>>) attributes {dimension_semantics = [#tpu.dimension_semantics<parallel>], iteration_bounds = array<i64: 1>, scalar_prefetch = 2 : i64, scratch_operands = 0 : i64, tpu.core_type = #tpu.core_type<tc>, window_params = [{transform_indices = @transform_0, window_bounds = array<i64: 8, 128>}, {transform_indices = @transform_1, window_bounds = array<i64: 8, 128>}]} {
    %c0 = arith.constant 0 : index
    %c0_0 = arith.constant 0 : index
    %0 = vector.load %arg3[%c0, %c0_0] : memref<8x128xf32, #tpu.memory_space<vmem>>, vector<8x128xf32>
    %c0_1 = arith.constant 0 : index
    %1 = memref.load %arg1[%c0_1] : memref<4xf32, #tpu.memory_space<smem>>
    %2 = vector.broadcast %1 : f32 to vector<8x128xf32>
    %3 = arith.mulf %0, %2 : vector<8x128xf32>
    %c1 = arith.constant 1 : index
    %4 = memref.load %arg1[%c1] : memref<4xf32, #tpu.memory_space<smem>>
    %5 = vector.broadcast %4 : f32 to vector<8x128xf32>
    %6 = arith.addf %3, %5 : vector<8x128xf32>
    %7 = arith.mulf %6, %0 : vector<8x128xf32>
    %c2 = arith.constant 2 : index
    %8 = memref.load %arg1[%c2] : memref<4xf32, #tpu.memory_space<smem>>
    %9 = vector.broadcast %8 : f32 to vector<8x128xf32>
    %10 = arith.addf %7, %9 : vector<8x128xf32>
    %11 = arith.mulf %10, %0 : vector<8x128xf32>
    %c3 = arith.constant 3 : index
    %12 = memref.load %arg1[%c3] : memref<4xf32, #tpu.memory_space<smem>>
    %13 = vector.broadcast %12 : f32 to vector<8x128xf32>
    %14 = arith.addf %11, %13 : vector<8x128xf32>
    %15 = arith.mulf %14, %0 : vector<8x128xf32>
    %c0_2 = arith.constant 0 : index
    %16 = memref.load %arg2[%c0_2] : memref<1xf32, #tpu.memory_space<smem>>
    %17 = vector.broadcast %16 : f32 to vector<8x128xf32>
    %18 = arith.addf %15, %17 : vector<8x128xf32>
    %c0_3 = arith.constant 0 : index
    %c0_4 = arith.constant 0 : index
    %19 = vector.load %arg4[%c0_3, %c0_4] : memref<8x128xf32, #tpu.memory_space<vmem>>, vector<8x128xf32>
    tpu.vector_store %arg4[%c0_3, %c0_4], %18 {strides = array<i32>} : memref<8x128xf32, #tpu.memory_space<vmem>>, vector<8x128xf32>,
    return
  }
  func.func @transform_0(%arg0: i32, %arg1: memref<4xf32, #tpu.memory_space<smem>>, %arg2: memref<1xf32, #tpu.memory_space<smem>>) -> (i32, i32) {
    %c0_i32 = arith.constant 0 : i32
    %c0_i32_0 = arith.constant 0 : i32
    return %arg0, %c0_i32 : i32, i32
  }
  func.func @transform_1(%arg0: i32, %arg1: memref<4xf32, #tpu.memory_space<smem>>, %arg2: memref<1xf32, #tpu.memory_space<smem>>) -> (i32, i32) {
    %c0_i32 = arith.constant 0 : i32
    %c0_i32_0 = arith.constant 0 : i32
    return %arg0, %c0_i32 : i32, i32
  }
}

</mosaic_0001>

<bundles_post_ra>
// kernel: tpu_custom_call.1
= control target key start
LH: loop header
LB: loop body
LE: loop exit
PB: predicated region body
PF: predicated region fallthrough
CT: control target
= control target key end

     0   :  { %s143_s15 = smov [#allocation3]   ;;  %s178_s0 = inlined_call_operand.vmem [shape: f32[4], index: 0, kind: input, shape index: {}]   ;;  %s179_s1 = inlined_call_operand.<no memory space> [shape: f32[1], index: 1, kind: input, shape index: {}]   ;;  %s180_s2 = inlined_call_operand.hbm [shape: f32[8,128], index: 2, kind: input, shape index: {}]   ;;  %s181_s3 = inlined_call_operand.hbm [shape: f32[8,128], index: 3, kind: output, shape index: {}]  }
   0x1   :  { %s9_s14 = sshll.u32 %s178_s0, 4  ;;  %s10_s14 = int_to_ptr.vmem [resolvable:$true] %s9_s14 }
   0x2   :  { %12 = dma.vmem_to_smem %s10_s14, 16, %s143_s15, [#allocation2] }
   0x3   :  { %137 = dma.done.wait [#allocation2], 16 }
   0x4   :  { %138 = vsyncadd [#allocation2], 4294967280 }
   0x5   :  { %16 = sfence }
   0x6   :  { %17 = vsyncpa [#allocation6], 0 }
   0x7   :  { %18 = vsyncpa [#allocation7], 0  ;;  %s24_s18 = sshll.u32 %s180_s2, 4  ;;  %s144_s19 = smov [#allocation5]   ;;  %s25_s18 = int_to_ptr.hbm [resolvable:$true] %s24_s18 }
   0x8   :  { %s26_s20 = sshll.u32 %s144_s19, 4  ;;  %s27_s20 = int_to_ptr.vmem [resolvable:$true] %s26_s20 }
   0x9   :  { %29 = dma.hbm_to_vmem [thread:$0]  %s25_s18, 128, %s27_s20, [#allocation6]  }
   0xa   :  { %139 = dma.done.wait [#allocation6], 128  }
   0xb   :  { %140 = vsyncadd [#allocation6], 4294967168  ;;  %s35_s0 = sld [smem:[#allocation3]]  ;;  %v34_v0 = vld [vmem:[#allocation5] sm:$0xff]  ;;  %v51_v11 = vstv %s179_s1  ;;  %s145_s25 = smov [#allocation8]  }
   0xc   :  { %s71_s21 = sld [smem:[#allocation3 + $0x1]]  ;;  %s59_s26 = sshll.u32 %s145_s25, 4  ;;  %s60_s26 = int_to_ptr.vmem [resolvable:$true] %s59_s26 }
   0xd   :  { %s72_s22 = sld [smem:[#allocation3 + $0x2]]  ;;  %s61_s29 = sshll.u32 %s181_s3, 4  ;;  %s62_s29 = int_to_ptr.hbm [resolvable:$true] %s61_s29 }
   0xe   :  { %s73_s23 = sld [smem:[#allocation3 + $0x3]] }
  0x11   :  { %v36_v1 = vstv %s35_s0 }
  0x12   :  { %v39_v2 = vstv %s71_s21  ;;  %v37_v3 = vmul.f32 %v36_v1, %v34_v0 }
  0x13   :  { %v43_v5 = vstv %s72_s22 }
  0x14   :  { %v40_v4 = vadd.f32 %v39_v2, %v37_v3  ;;  %v47_v8 = vstv %s73_s23 }
  0x16   :  { %v41_v6 = vmul.f32 %v40_v4, %v34_v0 }
  0x18   :  { %v44_v7 = vadd.f32 %v43_v5, %v41_v6 }
  0x1a   :  { %v45_v9 = vmul.f32 %v44_v7, %v34_v0 }
  0x1c   :  { %v48_v10 = vadd.f32 %v47_v8, %v45_v9 }
  0x1e   :  { %v49_v12 = vmul.f32 %v48_v10, %v34_v0 }
  0x20   :  { %v52_v13 = vadd.f32 %v51_v11, %v49_v12 }
  0x22   :  { %53 = vst [vmem:[#allocation8] sm:$0xff] %v52_v13 }
  0x23   :  { %64 = dma.vmem_to_hbm [thread:$0]  %s60_s26, 128, %s62_s29, [#allocation7]  }
  0x24   :  { %141 = dma.done.wait [#allocation7], 128  }
  0x25   :  { %142 = vsyncadd [#allocation7], 4294967168 }
  0x26   :  { %69 = vsyncpa [#allocation6], 1 }
  0x27   :  { %70 = vsyncpa [#allocation7], 1 }

</bundles_post_ra>
